<compile_context>
chip_gen: v5e
topology: v5e:2x2
jax: 0.10.0
libtpu: 0.0.40
codegen_flags: <defaults>
</compile_context>

<pallas_src>
import numpy as np
import jax
import jax.numpy as jnp
from jax.experimental import pallas as pl
from jax.experimental.pallas import tpu as pltpu


def _round_up(x, m):
    return ((x + m - 1) // m) * m


# ----------------------------- Pallas kernel ------------------------------ #
def _cond_ode_kernel(t_ref, hx_ref, u_ref, wq_ref, w1t_ref,
                     w2_ref, b2_ref, w3_ref, b3_ref, out_ref):
    # Padded shapes: t (TB,1), hx (TB,H), u/wq (Np,1), w1t (1,H),
    #                w2 (H,H) bf16, b2 (1,H), w3 (H,O) bf16, b3 (1,O),
    #                out (TB,O).
    t = t_ref[...]                                              # (TB, 1)

    # tau[b, j] = t[b]/2 * (1 + u[j]); the 0.5*(1+u) fold is done in the wrapper.
    tau3 = t[:, None, :] * u_ref[...][None, :, :]               # (TB, Np, 1)

    # --- Linear 1 + ReLU ---
    # Covariate part (x @ W1[1:] + b1) precomputed once per batch row in the
    # wrapper; the time column contributes tau * W1[0, :] via VPU broadcast-FMA.
    h1 = hx_ref[...][:, None, :] + tau3 * w1t_ref[...][None, :, :]  # (TB, Np, H)
    h1 = jnp.maximum(h1, 0.0)

    tb, n_pad, hdim = h1.shape
    h1_2d = h1.reshape(tb * n_pad, hdim).astype(jnp.bfloat16)

    # --- Linear 2 + ReLU (bf16 MXU operands, f32 accumulate) ---
    h2 = jnp.dot(h1_2d, w2_ref[...],
                 preferred_element_type=jnp.float32) + b2_ref[...]
    h2 = jnp.maximum(h2, 0.0).astype(jnp.bfloat16)

    # --- Linear 3 + Softplus (numerically stable) ---
    z = jnp.dot(h2, w3_ref[...],
                preferred_element_type=jnp.float32) + b3_ref[...]
    f = jnp.log1p(jnp.exp(-jnp.abs(z))) + jnp.maximum(z, 0.0)    # (TB*Np, O)

    # --- Gauss-Legendre quadrature: pred[b] = t[b] * sum_j (w[j]/2) f[b, j, :]
    # (the 0.5 is folded into wq in the wrapper).
    f3 = f.reshape(tb, n_pad, -1)                                # (TB, Np, O)
    s = jnp.sum(f3 * wq_ref[...][None, :, :], axis=1)            # (TB, O)

    out_ref[...] = jnp.tanh(t * s)


# ------------------------------ wrapper ----------------------------------- #
def cond_ode_net_forward(x_, params, u_n, w_n, n, *, tb=256):
    """x_: (B, 1+cov_dim) float32. Returns tanh(pred): (B, output_dim)."""
    w1, b1, w2, b2, w3, b3 = params
    B = x_.shape[0]
    hidden = w1.shape[1]
    out_dim = w3.shape[1]

    # Lane/sublane-friendly padded sizes.
    H = _round_up(hidden, 128)        # hidden  -> lane multiple
    O = _round_up(out_dim, 128)       # output  -> lane-dense stores
    N = _round_up(n, 8)               # nodes   -> sublane multiple

    # Batch tile: at least 2 grid steps when B allows (v7x has 2 TensorCores),
    # capped at tb; multiple of 8 (sublane).
    TB = max(8, min(tb, _round_up((B + 1) // 2, 8)))
    Bp = _round_up(B, TB)

    t = x_[:, 0:1].astype(jnp.float32)
    x = x_[:, 1:].astype(jnp.float32)

    # Hoist the tiny-K covariate contraction off the MXU: compute once per
    # batch row in XLA, fold b1 in, pad to (Bp, H).  Handles cov_dim == 0 too.
    hx = x @ w1[1:, :].astype(jnp.float32) + jnp.reshape(b1, (1, -1))
    hx = jnp.pad(hx, ((0, Bp - B), (0, H - hidden)))
    if Bp != B:
        t = jnp.pad(t, ((0, Bp - B), (0, 0)))

    # Pre-folded quadrature constants; padded nodes carry weight 0.
    u_col = jnp.pad(0.5 * (1.0 + u_n.astype(jnp.float32)), (0, N - n)).reshape(N, 1)
    w_col = jnp.pad(0.5 * w_n.astype(jnp.float32), (0, N - n)).reshape(N, 1)

    # W1 time row (f32, VPU); W2/W3 shipped as bf16 for the MXU; biases f32.
    w1t = jnp.pad(w1[0:1, :], ((0, 0), (0, H - hidden))).astype(jnp.float32)
    w2p = jnp.pad(w2, ((0, H - hidden), (0, H - hidden))).astype(jnp.bfloat16)
    b2p = jnp.pad(jnp.reshape(b2, (1, -1)), ((0, 0), (0, H - hidden))).astype(jnp.float32)
    w3p = jnp.pad(w3, ((0, H - hidden), (0, O - out_dim))).astype(jnp.bfloat16)
    b3p = jnp.pad(jnp.reshape(b3, (1, -1)), ((0, 0), (0, O - out_dim))).astype(jnp.float32)

    grid = (Bp // TB,)
    batch_spec = lambda shape: pl.BlockSpec(shape, lambda i: (i, 0))
    const_spec = lambda shape: pl.BlockSpec(shape, lambda i: (0, 0))

    out = pl.pallas_call(
        _cond_ode_kernel,
        out_shape=jax.ShapeDtypeStruct((Bp, O), jnp.float32),
        grid=grid,
        in_specs=[
            batch_spec((TB, 1)),          # t
            batch_spec((TB, H)),          # hx = x @ W1[1:] + b1
            const_spec((N, 1)),           # 0.5 * (1 + u_n)
            const_spec((N, 1)),           # 0.5 * w_n
            const_spec((1, H)),           # W1 time row
            const_spec((H, H)),           # W2 (bf16)
            const_spec((1, H)),           # b2
            const_spec((H, O)),           # W3 (bf16)
            const_spec((1, O)),           # b3
        ],
        out_specs=batch_spec((TB, O)),
        compiler_params=pltpu.CompilerParams(
            dimension_semantics=("parallel",),
            vmem_limit_bytes=48 * 1024 * 1024),
    )(t, hx, u_col, w_col, w1t, w2p, b2p, w3p, b3p)

    return out[:B, :out_dim]


# --------------------------- parameter setup ------------------------------ #
def init_params(key, cov_dim, hidden_dim, output_dim):
    """Deterministic init mirroring the module shapes.
    Weights stored as (in, out); kaiming_normal(fan_out) std = sqrt(2/out)."""
    k1, k2, k3, k4 = jax.random.split(key, 4)
    in_dim = cov_dim + 1
    w1 = jax.random.normal(k1, (in_dim, hidden_dim), jnp.float32) * np.sqrt(2.0 / hidden_dim)
    b1 = jnp.zeros((1, hidden_dim), jnp.float32)
    w2 = jax.random.normal(k2, (hidden_dim, hidden_dim), jnp.float32) * np.sqrt(2.0 / hidden_dim)
    b2 = jnp.zeros((1, hidden_dim), jnp.float32)
    # third Linear keeps PyTorch-default-like uniform init
    bound = 1.0 / np.sqrt(hidden_dim)
    w3 = jax.random.uniform(k3, (hidden_dim, output_dim), jnp.float32, -bound, bound)
    b3 = jax.random.uniform(k4, (1, output_dim), jnp.float32, -bound, bound)
    return (w1, b1, w2, b2, w3, b3)


# ---------------------------- pure-JAX reference --------------------------- #
def _reference(x_, params, u_n, w_n, n):
    w1, b1, w2, b2, w3, b3 = params
    t = x_[:, 0:1]
    x = x_[:, 1:]
    tau = (t * 0.5) * (1.0 + u_n[None, :])
    taux = jnp.concatenate([tau.reshape(-1, 1), jnp.repeat(x, n, axis=0)], axis=1)
    h = jnp.maximum(taux @ w1 + b1, 0.0)
    h = jnp.maximum(h @ w2 + b2, 0.0)
    f = jax.nn.softplus(h @ w3 + b3)
    f_n = f.reshape(t.shape[0], n, -1)
    pred = (t * 0.5) * jnp.sum(w_n[None, :, None] * f_n, axis=1)
    return jnp.tanh(pred)


if __name__ == "__main__":
    # small shapes consistent with the module
    B, cov_dim, hidden_dim, output_dim, n = 8, 4, 32, 6, 15

    key = jax.random.PRNGKey(0)
    kx, kp = jax.random.split(key)

    # input: column 0 = positive time, remaining columns = covariates
    t_in = jax.random.uniform(kx, (B, 1), jnp.float32, 0.1, 2.0)
    x_cov = jax.random.normal(jax.random.fold_in(kx, 1), (B, cov_dim), jnp.float32)
    x_ = jnp.concatenate([t_in, x_cov], axis=1)                     # (B, 1+cov_dim)

    params = init_params(kp, cov_dim, hidden_dim, output_dim)

    u_np, w_np = np.polynomial.legendre.leggauss(n)
    u_n = jnp.asarray(u_np, jnp.float32)
    w_n = jnp.asarray(w_np, jnp.float32)

    out = cond_ode_net_forward(x_, params, u_n, w_n, n)
    out = jax.block_until_ready(out)

    ref = _reference(x_, params, u_n, w_n, n)
    assert out.shape == (B, output_dim)
    # Tolerance relaxed because the two large matmuls run with bf16 operands
    # (f32 accumulation) on the MXU.
    np.testing.assert_allclose(np.asarray(out), np.asarray(ref), rtol=2e-2, atol=2e-2)

    print("KERNEL_OK")
</pallas_src>

<mosaic_0001>
module attributes {stable_mosaic.version = 11 : i64} {
  func.func @_cond_ode_kernel(%arg0: i32, %arg1: memref<8x1xf32, #tpu.memory_space<vmem>>, %arg2: memref<8x128xf32, #tpu.memory_space<vmem>>, %arg3: memref<16x1xf32, #tpu.memory_space<vmem>>, %arg4: memref<16x1xf32, #tpu.memory_space<vmem>>, %arg5: memref<1x128xf32, #tpu.memory_space<vmem>>, %arg6: memref<128x128xbf16, #tpu.memory_space<vmem>>, %arg7: memref<1x128xf32, #tpu.memory_space<vmem>>, %arg8: memref<128x128xbf16, #tpu.memory_space<vmem>>, %arg9: memref<1x128xf32, #tpu.memory_space<vmem>>, %arg10: memref<8x128xf32, #tpu.memory_space<vmem>>) attributes {dimension_semantics = [#tpu.dimension_semantics<parallel>], iteration_bounds = array<i64: 1>, scalar_prefetch = 0 : i64, scratch_operands = 0 : i64, tpu.core_type = #tpu.core_type<tc>, window_params = [{transform_indices = @transform_0, window_bounds = array<i64: 8, 1>}, {transform_indices = @transform_1, window_bounds = array<i64: 8, 128>}, {pipeline_mode = #tpu.pipeline_mode<synchronous>, transform_indices = @transform_2, window_bounds = array<i64: 16, 1>}, {pipeline_mode = #tpu.pipeline_mode<synchronous>, transform_indices = @transform_3, window_bounds = array<i64: 16, 1>}, {pipeline_mode = #tpu.pipeline_mode<synchronous>, transform_indices = @transform_4, window_bounds = array<i64: 1, 128>}, {pipeline_mode = #tpu.pipeline_mode<synchronous>, transform_indices = @transform_5, window_bounds = array<i64: 128, 128>}, {pipeline_mode = #tpu.pipeline_mode<synchronous>, transform_indices = @transform_6, window_bounds = array<i64: 1, 128>}, {pipeline_mode = #tpu.pipeline_mode<synchronous>, transform_indices = @transform_7, window_bounds = array<i64: 128, 128>}, {pipeline_mode = #tpu.pipeline_mode<synchronous>, transform_indices = @transform_8, window_bounds = array<i64: 1, 128>}, {transform_indices = @transform_9, window_bounds = array<i64: 8, 128>}]} {
    %c0 = arith.constant 0 : index
    %c0_0 = arith.constant 0 : index
    %0 = vector.load %arg1[%c0, %c0_0] : memref<8x1xf32, #tpu.memory_space<vmem>>, vector<8x1xf32>
    %1 = vector.shape_cast %0 : vector<8x1xf32> to vector<8x1x1xf32>
    %c0_1 = arith.constant 0 : index
    %c0_2 = arith.constant 0 : index
    %2 = vector.load %arg3[%c0_1, %c0_2] : memref<16x1xf32, #tpu.memory_space<vmem>>, vector<16x1xf32>
    %3 = vector.shape_cast %2 : vector<16x1xf32> to vector<1x16x1xf32>
    %4 = vector.broadcast %1 : vector<8x1x1xf32> to vector<8x16x1xf32>
    %5 = vector.broadcast %3 : vector<1x16x1xf32> to vector<8x16x1xf32>
    %6 = arith.mulf %4, %5 : vector<8x16x1xf32>
    %c0_3 = arith.constant 0 : index
    %c0_4 = arith.constant 0 : index
    %7 = vector.load %arg2[%c0_3, %c0_4] : memref<8x128xf32, #tpu.memory_space<vmem>>, vector<8x128xf32>
    %8 = vector.shape_cast %7 : vector<8x128xf32> to vector<8x1x128xf32>
    %c0_5 = arith.constant 0 : index
    %c0_6 = arith.constant 0 : index
    %9 = vector.load %arg5[%c0_5, %c0_6] : memref<1x128xf32, #tpu.memory_space<vmem>>, vector<1x128xf32>
    %10 = vector.shape_cast %9 : vector<1x128xf32> to vector<1x1x128xf32>
    %11 = vector.broadcast %6 : vector<8x16x1xf32> to vector<8x16x128xf32>
    %12 = vector.broadcast %10 : vector<1x1x128xf32> to vector<8x16x128xf32>
    %13 = arith.mulf %11, %12 : vector<8x16x128xf32>
    %14 = vector.broadcast %8 : vector<8x1x128xf32> to vector<8x16x128xf32>
    %15 = arith.addf %14, %13 : vector<8x16x128xf32>
    %cst = arith.constant 0.000000e+00 : f32
    %16 = vector.broadcast %cst : f32 to vector<8x16x128xf32>
    %17 = arith.maximumf %15, %16 : vector<8x16x128xf32>
    %18 = vector.shape_cast %17 : vector<8x16x128xf32> to vector<128x128xf32>
    %19 = arith.truncf %18 : vector<128x128xf32> to vector<128x128xbf16>
    %c0_7 = arith.constant 0 : index
    %c0_8 = arith.constant 0 : index
    %20 = vector.load %arg6[%c0_7, %c0_8] : memref<128x128xbf16, #tpu.memory_space<vmem>>, vector<128x128xbf16>
    %cst_9 = arith.constant dense<0.000000e+00> : vector<128x128xf32>
    %21 = tpu.matmul %19, %20, %cst_9 {dimension_numbers = #tpu.dot_dimension_numbers<[1], [0], [0], [1], [0, 0, 1, 1], [], []>} : vector<128x128xbf16>, vector<128x128xbf16>, vector<128x128xf32> -> vector<128x128xf32>
    %c0_10 = arith.constant 0 : index
    %c0_11 = arith.constant 0 : index
    %22 = vector.load %arg7[%c0_10, %c0_11] : memref<1x128xf32, #tpu.memory_space<vmem>>, vector<1x128xf32>
    %23 = vector.broadcast %22 : vector<1x128xf32> to vector<128x128xf32>
    %24 = arith.addf %21, %23 : vector<128x128xf32>
    %cst_12 = arith.constant 0.000000e+00 : f32
    %25 = vector.broadcast %cst_12 : f32 to vector<128x128xf32>
    %26 = arith.maximumf %24, %25 : vector<128x128xf32>
    %27 = arith.truncf %26 : vector<128x128xf32> to vector<128x128xbf16>
    %c0_13 = arith.constant 0 : index
    %c0_14 = arith.constant 0 : index
    %28 = vector.load %arg8[%c0_13, %c0_14] : memref<128x128xbf16, #tpu.memory_space<vmem>>, vector<128x128xbf16>
    %cst_15 = arith.constant dense<0.000000e+00> : vector<128x128xf32>
    %29 = tpu.matmul %27, %28, %cst_15 {dimension_numbers = #tpu.dot_dimension_numbers<[1], [0], [0], [1], [0, 0, 1, 1], [], []>} : vector<128x128xbf16>, vector<128x128xbf16>, vector<128x128xf32> -> vector<128x128xf32>
    %c0_16 = arith.constant 0 : index
    %c0_17 = arith.constant 0 : index
    %30 = vector.load %arg9[%c0_16, %c0_17] : memref<1x128xf32, #tpu.memory_space<vmem>>, vector<1x128xf32>
    %31 = vector.broadcast %30 : vector<1x128xf32> to vector<128x128xf32>
    %32 = arith.addf %29, %31 : vector<128x128xf32>
    %33 = math.absf %32 : vector<128x128xf32>
    %cst_18 = arith.constant 0.000000e+00 : f32
    %34 = vector.broadcast %cst_18 : f32 to vector<128x128xf32>
    %35 = arith.subf %34, %33 : vector<128x128xf32>
    %36 = math.exp %35 : vector<128x128xf32>
    %37 = math.log1p %36 : vector<128x128xf32>
    %cst_19 = arith.constant 0.000000e+00 : f32
    %38 = vector.broadcast %cst_19 : f32 to vector<128x128xf32>
    %39 = arith.maximumf %32, %38 : vector<128x128xf32>
    %40 = arith.addf %37, %39 : vector<128x128xf32>
    %41 = vector.shape_cast %40 : vector<128x128xf32> to vector<8x16x128xf32>
    %c0_20 = arith.constant 0 : index
    %c0_21 = arith.constant 0 : index
    %42 = vector.load %arg4[%c0_20, %c0_21] : memref<16x1xf32, #tpu.memory_space<vmem>>, vector<16x1xf32>
    %43 = vector.shape_cast %42 : vector<16x1xf32> to vector<1x16x1xf32>
    %44 = vector.broadcast %43 : vector<1x16x1xf32> to vector<8x16x128xf32>
    %45 = arith.mulf %41, %44 : vector<8x16x128xf32>
    %cst_22 = arith.constant dense<0.000000e+00> : vector<8x128xf32>
    %46 = vector.multi_reduction <add>, %45, %cst_22 [1] : vector<8x16x128xf32> to vector<8x128xf32>
    %47 = vector.broadcast %0 : vector<8x1xf32> to vector<8x128xf32>
    %48 = arith.mulf %47, %46 : vector<8x128xf32>
    %49 = math.tanh %48 : vector<8x128xf32>
    %c0_23 = arith.constant 0 : index
    %c0_24 = arith.constant 0 : index
    %50 = vector.load %arg10[%c0_23, %c0_24] : memref<8x128xf32, #tpu.memory_space<vmem>>, vector<8x128xf32>
    tpu.vector_store %arg10[%c0_23, %c0_24], %49 {strides = array<i32>} : memref<8x128xf32, #tpu.memory_space<vmem>>, vector<8x128xf32>,
    return
  }
  func.func @transform_0(%arg0: i32) -> (i32, i32) {
    %c0_i32 = arith.constant 0 : i32
    %c0_i32_0 = arith.constant 0 : i32
    return %arg0, %c0_i32 : i32, i32
  }
  func.func @transform_1(%arg0: i32) -> (i32, i32) {
    %c0_i32 = arith.constant 0 : i32
    %c0_i32_0 = arith.constant 0 : i32
    return %arg0, %c0_i32 : i32, i32
  }
  func.func @transform_2(%arg0: i32) -> (i32, i32) {
    %c0_i32 = arith.constant 0 : i32
    %c0_i32_0 = arith.constant 0 : i32
    %c0_i32_1 = arith.constant 0 : i32
    return %c0_i32, %c0_i32_0 : i32, i32
  }
  func.func @transform_3(%arg0: i32) -> (i32, i32) {
    %c0_i32 = arith.constant 0 : i32
    %c0_i32_0 = arith.constant 0 : i32
    %c0_i32_1 = arith.constant 0 : i32
    return %c0_i32, %c0_i32_0 : i32, i32
  }
  func.func @transform_4(%arg0: i32) -> (i32, i32) {
    %c0_i32 = arith.constant 0 : i32
    %c0_i32_0 = arith.constant 0 : i32
    %c0_i32_1 = arith.constant 0 : i32
    return %c0_i32, %c0_i32_0 : i32, i32
  }
  func.func @transform_5(%arg0: i32) -> (i32, i32) {
    %c0_i32 = arith.constant 0 : i32
    %c0_i32_0 = arith.constant 0 : i32
    %c0_i32_1 = arith.constant 0 : i32
    return %c0_i32, %c0_i32_0 : i32, i32
  }
  func.func @transform_6(%arg0: i32) -> (i32, i32) {
    %c0_i32 = arith.constant 0 : i32
    %c0_i32_0 = arith.constant 0 : i32
    %c0_i32_1 = arith.constant 0 : i32
    return %c0_i32, %c0_i32_0 : i32, i32
  }
  func.func @transform_7(%arg0: i32) -> (i32, i32) {
    %c0_i32 = arith.constant 0 : i32
    %c0_i32_0 = arith.constant 0 : i32
    %c0_i32_1 = arith.constant 0 : i32
    return %c0_i32, %c0_i32_0 : i32, i32
  }
  func.func @transform_8(%arg0: i32) -> (i32, i32) {
    %c0_i32 = arith.constant 0 : i32
    %c0_i32_0 = arith.constant 0 : i32
    %c0_i32_1 = arith.constant 0 : i32
    return %c0_i32, %c0_i32_0 : i32, i32
  }
  func.func @transform_9(%arg0: i32) -> (i32, i32) {
    %c0_i32 = arith.constant 0 : i32
    %c0_i32_0 = arith.constant 0 : i32
    return %arg0, %c0_i32 : i32, i32
  }
}

</mosaic_0001>

<bundles_post_ra>
// kernel: tpu_custom_call.1
= control target key start
LH: loop header
LB: loop body
LE: loop exit
PB: predicated region body
PF: predicated region fallthrough
CT: control target
= control target key end

     0   :  { %14 = vsyncpa [#allocation3], 0  ;;  %s1540_s0 = inlined_call_operand.vmem [shape: f32[8,1], index: 0, kind: input, shape index: {}]   ;;  %s1541_s1 = inlined_call_operand.vmem [shape: f32[8,128], index: 1, kind: input, shape index: {}]   ;;  %s1542_s2 = inlined_call_operand.vmem [shape: f32[16,1], index: 2, kind: input, shape index: {}]   ;;  %s1543_s3 = inlined_call_operand.vmem [shape: f32[16,1], index: 3, kind: input, shape index: {}]   ;;  %s1544_s4 = inlined_call_operand.vmem [shape: f32[1,128], index: 4, kind: input, shape index: {}]   ;;  %s1545_s5 = inlined_call_operand.hbm [shape: bf16[128,128], index: 5, kind: input, shape index: {}]   ;;  %s1546_s6 = inlined_call_operand.vmem [shape: f32[1,128], index: 6, kind: input, shape index: {}]   ;;  %s1547_s7 = inlined_call_operand.hbm [shape: bf16[128,128], index: 7, kind: input, shape index: {}]   ;;  %s1548_s8 = inlined_call_operand.vmem [shape: f32[1,128], index: 8, kind: input, shape index: {}]   ;;  %s1549_s9 = inlined_call_operand.hbm [shape: f32[8,128], index: 9, kind: output, shape index: {}]  }
   0x1   :  { %15 = vsyncpa [#allocation6], 0 }
   0x2   :  { %16 = vsyncpa [#allocation4], 0  ;;  %s31_s11 = sshll.u32 %s1545_s5, 4  ;;  %s1155_s12 = smov [#allocation2]   ;;  %s32_s11 = int_to_ptr.hbm [resolvable:$true] %s31_s11 }
   0x3   :  { %s33_s13 = sshll.u32 %s1155_s12, 4  ;;  %s46_s16 = sshll.u32 %s1547_s7, 4  ;;  %s34_s13 = int_to_ptr.vmem [resolvable:$true] %s33_s13  ;;  %s47_s16 = int_to_ptr.hbm [resolvable:$true] %s46_s16 }
   0x4   :  { %s1156_s17 = smov 64   ;;  %s1157_s18 = smov 4  }
   0x5   :  { %39 = dma.hbm_to_vmem [thread:$0]  %s32_s11, 1024, %s34_s13, [#allocation3], %s1156_s17, %s1156_s17, %s1157_s18  }
   0x6   :  { %s1158_s19 = smov [#allocation5]  }
   0x7   :  { %s48_s20 = sshll.u32 %s1158_s19, 4  ;;  %s49_s20 = int_to_ptr.vmem [resolvable:$true] %s48_s20 }
   0x8   :  { %54 = dma.hbm_to_vmem [thread:$0]  %s47_s16, 1024, %s49_s20, [#allocation6], %s1156_s17, %s1156_s17, %s1157_s18  }
   0x9   :  { %1149 = dma.done.wait [#allocation3], 1024  }
   0xa   :  { %1150 = vsyncadd [#allocation3], 4294966272 }
   0xb   :  { %1151 = dma.done.wait [#allocation6], 1024  }
   0xc   :  { %1152 = vsyncadd [#allocation6], 4294966272  ;;  %v1159_v0 = vmov 0   ;;  %v65_v1 = vld [vmem:[%s1540_s0] sm:$0xff]  ;;  %v75_v11 = vld [vmem:[%s1542_s2 + $0x8] sm:$0xff]  ;;  %s892_s13 = sshll.u32 %s1549_s9, 4  ;;  %s893_s13 = int_to_ptr.hbm [resolvable:$true] %s892_s13 }
   0xd   :  { %1006 = vset.pattern.permute.xlu1 %v1159_v0  ;;  %1007 = vset.pattern.permute.xlu2 %v1159_v0  ;;  %v74_v2 = vld [vmem:[%s1542_s2] sm:$0xff]  ;;  %v76_v3 = vperm.slane %v65_v1, 0  ;;  %v71_v4 = vrot.slane %v65_v1, 5  ;;  %v70_v5 = vrot.slane %v65_v1, 4  ;;  %v67_v13 = vrot.slane %v65_v1, 1  ;;  %v772_v36 = vld [vmem:[%s1543_s3 + $0x8] sm:$0xff] }
   0xe   :  { %1005 = vset.pattern.permute.xlu0 %v1159_v0  ;;  %v72_v16 = vrot.slane %v65_v1, 6  ;;  %v68_v20 = vrot.slane %v65_v1, 2  ;;  %v73_v25 = vrot.slane %v65_v1, 7  ;;  %v69_v28 = vrot.slane %v65_v1, 3  ;;  %v771_v34 = vld [vmem:[%s1543_s3] sm:$0xff]  ;;  %v974_v37 = vld [vmem:[#allocation2 + $0x38] sm:$0xff] }
   0xf   :  { %v92_v6 = vmul.f32 %v76_v3, %v74_v2  ;;  %v81_v7 = vperm.slane %v71_v4, 0  ;;  %v80_v8 = vperm.slane %v70_v5, 0  ;;  %v93_v12 = vmul.f32 %v76_v3, %v75_v11  ;;  %341 = vmatpush.bf16.msra.mxu0 %v974_v37  ;;  %983 = vmatpush.bf16.msra.mxu2 %v974_v37  ;;  %v973_v38 = vld [vmem:[#allocation2 + $0x30] sm:$0xff]  ;;  %v972_v39 = vld [vmem:[#allocation2 + $0x28] sm:$0xff]  ;;  %v971_v40 = vld [vmem:[#allocation2 + $0x20] sm:$0xff] }
  0x10   :  { %v77_v17 = vperm.slane %v67_v13, 0  ;;  %v82_v18 = vperm.slane %v72_v16, 0  ;;  %v78_v23 = vperm.slane %v68_v20, 0  ;;  %v83_v29 = vperm.slane %v73_v25, 0  ;;  %v970_v41 = vld [vmem:[#allocation2 + $0x18] sm:$0xff]  ;;  %v969_v42 = vld [vmem:[#allocation2 + $0x10] sm:$0xff] }
  0x11   :  { %120 = vperm.xlu1 %1006, %v92_v6   ;;  %v102_v9 = vmul.f32 %v81_v7, %v74_v2  ;;  %v100_v10 = vmul.f32 %v80_v8, %v74_v2  ;;  %v103_v14 = vmul.f32 %v81_v7, %v75_v11  ;;  %v101_v15 = vmul.f32 %v80_v8, %v75_v11  ;;  %v968_v43 = vld [vmem:[#allocation2 + $0x8] sm:$0xff]  ;;  %v967_v44 = vld [vmem:[#allocation2] sm:$0xff]  ;;  %v981_v37 = vld [vmem:[#allocation5 + $0x30] sm:$0xff] }
  0x12   :  { %v95_v19 = vmul.f32 %v77_v17, %v75_v11  ;;  %v104_v21 = vmul.f32 %v82_v18, %v74_v2  ;;  %v94_v22 = vmul.f32 %v77_v17, %v74_v2  ;;  %v96_v24 = vmul.f32 %v78_v23, %v74_v2  ;;  %v1235_v45 = vld [vmem:[%s1541_s1] sm:$0xff] }
  0x13   :  { %170 = vperm.xlu2 %1007, %v102_v9   ;;  %160 = vperm.xlu0 %1005, %v100_v10   ;;  %v97_v26 = vmul.f32 %v78_v23, %v75_v11  ;;  %v105_v27 = vmul.f32 %v82_v18, %v75_v11  ;;  %v79_v30 = vperm.slane %v69_v28, 0  ;;  %v107_v31 = vmul.f32 %v83_v29, %v75_v11  ;;  %v1240_v47 = vld [vmem:[%s1544_s4] ss:$0 sm:$0xff] }
  0x14   :  { %v106_v33 = vmul.f32 %v83_v29, %v74_v2  ;;  %342 = vmatpush.bf16.msra.mxu0 %v973_v38  ;;  %984 = vmatpush.bf16.msra.mxu2 %v973_v38  ;;  %v217_v49 = vperm.slane %v1235_v45, 0  ;;  %v113_v51 = vrot.slane %v1235_v45, 4  ;;  %v114_v4 = vrot.slane %v1235_v45, 5 }
  0x15   :  { %v98_v32 = vmul.f32 %v79_v30, %v74_v2  ;;  %v99_v35 = vmul.f32 %v79_v30, %v75_v11  ;;  %v110_v6 = vrot.slane %v1235_v45, 1  ;;  %v111_v28 = vrot.slane %v1235_v45, 2 }
  0x16   :  { %v221_v54 = vperm.slane %v113_v51, 0  ;;  %v222_v11 = vperm.slane %v114_v4, 0  ;;  %v115_v30 = vrot.slane %v1235_v45, 6  ;;  %v979_v51 = vld [vmem:[#allocation5 + $0x20] sm:$0xff] }
  0x18   :  { %343 = vmatpush.bf16.msra.mxu0 %v972_v39  ;;  %985 = vmatpush.bf16.msra.mxu2 %v972_v39  ;;  %v223_v39 = vperm.slane %v115_v30, 0 }
  0x19   :  { %125 = vperm.xlu1 %1006, %v93_v12  }
  0x1b   :  { %175 = vperm.xlu2 %1007, %v103_v14   ;;  %165 = vperm.xlu0 %1005, %v101_v15   ;;  %v218_v14 = vperm.slane %v110_v6, 0 }
  0x1c   :  { %344 = vmatpush.bf16.msra.mxu0 %v971_v40  ;;  %986 = vmatpush.bf16.msra.mxu2 %v971_v40 }
  0x20   :  { %345 = vmatpush.bf16.msra.mxu0 %v970_v41  ;;  %987 = vmatpush.bf16.msra.mxu2 %v970_v41 }
  0x21   :  { %135 = vperm.xlu1 %1006, %v95_v19  }
  0x23   :  { %180 = vperm.xlu2 %1007, %v104_v21   ;;  %130 = vperm.xlu0 %1005, %v94_v22  }
  0x24   :  { %346 = vmatpush.bf16.msra.mxu0 %v969_v42  ;;  %988 = vmatpush.bf16.msra.mxu2 %v969_v42 }
  0x28   :  { %347 = vmatpush.bf16.msra.mxu0 %v968_v43  ;;  %989 = vmatpush.bf16.msra.mxu2 %v968_v43 }
  0x29   :  { %140 = vperm.xlu1 %1006, %v96_v24  }
  0x2b   :  { %145 = vperm.xlu2 %1007, %v97_v26   ;;  %185 = vperm.xlu0 %1005, %v105_v27  }
  0x2c   :  { %348 = vmatpush.bf16.msra.mxu0 %v967_v44  ;;  %990 = vmatpush.bf16.msra.mxu2 %v967_v44  ;;  %v980_v44 = vld [vmem:[#allocation5 + $0x28] sm:$0xff] }
  0x31   :  { %195 = vperm.xlu1 %1006, %v107_v31  }
  0x33   :  { %150 = vperm.xlu2 %1007, %v98_v32   ;;  %190 = vperm.xlu0 %1005, %v106_v33   ;;  %v982_v32 = vld [vmem:[#allocation5 + $0x38] sm:$0xff] }
  0x34   :  { %482 = vmatpush.bf16.msra.mxu1 %v982_v32  ;;  %991 = vmatpush.bf16.msra.mxu3 %v982_v32 }
  0x38   :  { %483 = vmatpush.bf16.msra.mxu1 %v981_v37  ;;  %992 = vmatpush.bf16.msra.mxu3 %v981_v37 }
  0x39   :  { %775 = vperm.xlu1 %1006, %v771_v34   ;;  %v219_v34 = vperm.slane %v111_v28, 0 }
  0x3b   :  { %780 = vperm.xlu2 %1007, %v772_v36   ;;  %155 = vperm.xlu0 %1005, %v99_v35  }
  0x3c   :  { %484 = vmatpush.bf16.msra.mxu1 %v980_v44  ;;  %993 = vmatpush.bf16.msra.mxu3 %v980_v44 }
  0x40   :  { %485 = vmatpush.bf16.msra.mxu1 %v979_v51  ;;  %994 = vmatpush.bf16.msra.mxu3 %v979_v51 }
  0x43   :  { %856 = vperm.xlu0 %1005, %v65_v1  }
  0x6d   :  { %v171_v52 = vpop.permute.xlu2 %170 }
  0x6e   :  { %v211_v12 = vmul.f32 %v1240_v47, %v171_v52 }
  0x70   :  { %v243_v17 = vadd.f32 %v222_v11, %v211_v12  ;;  %v977_v12 = vld [vmem:[#allocation5 + $0x10] sm:$0xff] }
  0x72   :  { %v259_v23 = vmax.f32 %v243_v17, 0.0 }
  0x75   :  { %v176_v5 = vpop.permute.xlu2 %175 }
  0x76   :  { %v212_v13 = vmul.f32 %v1240_v47, %v176_v5 }
  0x78   :  { %v244_v18 = vadd.f32 %v222_v11, %v212_v13  ;;  %v978_v11 = vld [vmem:[#allocation5 + $0x18] sm:$0xff]  ;;  %v976_v13 = vld [vmem:[#allocation5 + $0x8] sm:$0xff] }
  0x79   :  { %486 = vmatpush.bf16.msra.mxu1 %v978_v11  ;;  %995 = vmatpush.bf16.msra.mxu3 %v978_v11 }
  0x7a   :  { %v260_v24 = vmax.f32 %v244_v18, 0.0 }
  0x7c   :  { %v270_v29 = vpack.c.bf16 %v260_v24, %v259_v23 }
  0x7d   :  { %v181_v20 = vpop.permute.xlu2 %180  ;;  %487 = vmatpush.bf16.msra.mxu1 %v977_v12  ;;  %996 = vmatpush.bf16.msra.mxu3 %v977_v12 }
  0x7e   :  { %v213_v40 = vmul.f32 %v1240_v47, %v181_v20 }
  0x81   :  { %488 = vmatpush.bf16.msra.mxu1 %v976_v13  ;;  %997 = vmatpush.bf16.msra.mxu3 %v976_v13 }
  0x83   :  { %v121_v46 = vpop.permute.xlu1 %120 }
  0x84   :  { %v201_v50 = vmul.f32 %v1240_v47, %v121_v46  ;;  %v245_v46 = vadd.f32 %v223_v39, %v213_v40 }
  0x85   :  { %v161_v48 = vpop.permute.xlu0 %160  ;;  %v146_v33 = vpop.permute.xlu2 %145 }
  0x86   :  { %v233_v53 = vadd.f32 %v217_v49, %v201_v50  ;;  %v209_v55 = vmul.f32 %v1240_v47, %v161_v48  ;;  %v206_v35 = vmul.f32 %v1240_v47, %v146_v33  ;;  %v261_v52 = vmax.f32 %v245_v46, 0.0 }
  0x88   :  { %v249_v59 = vmax.f32 %v233_v53, 0.0  ;;  %v241_v60 = vadd.f32 %v221_v54, %v209_v55  ;;  %v238_v42 = vadd.f32 %v219_v34, %v206_v35  ;;  %v112_v55 = vrot.slane %v1235_v45, 3 }
  0x8a   :  { %v257_v1 = vmax.f32 %v241_v60, 0.0 }
  0x8b   :  { %v126_v56 = vpop.permute.xlu1 %125 }
  0x8c   :  { %v202_v57 = vmul.f32 %v1240_v47, %v126_v56 }
  0x8d   :  { %v166_v58 = vpop.permute.xlu0 %165 }
  0x8e   :  { %v234_v61 = vadd.f32 %v217_v49, %v202_v57  ;;  %v210_v62 = vmul.f32 %v1240_v47, %v166_v58  ;;  %v254_v49 = vmax.f32 %v238_v42, 0.0  ;;  %v116_v57 = vrot.slane %v1235_v45, 7 }
  0x90   :  { %v250_v63 = vmax.f32 %v234_v61, 0.0  ;;  %v242_v0 = vadd.f32 %v221_v54, %v210_v62  ;;  %v220_v61 = vperm.slane %v112_v55, 0 }
  0x92   :  { %v258_v2 = vmax.f32 %v242_v0, 0.0  ;;  %v265_v3 = vpack.c.bf16 %v250_v63, %v249_v59  ;;  %v151_v59 = vpop.permute.xlu2 %150  ;;  %v224_v0 = vperm.slane %v116_v57, 0 }
  0x93   :  { %v136_v8 = vpop.permute.xlu1 %135  ;;  %v207_v62 = vmul.f32 %v1240_v47, %v151_v59 }
  0x94   :  { %349 = vmatmul.bf16.vlgmr.msra.gmra.mxu0 %v265_v3  ;;  %v269_v7 = vpack.c.bf16 %v258_v2, %v257_v1  ;;  %v204_v15 = vmul.f32 %v1240_v47, %v136_v8 }
  0x95   :  { %v131_v9 = vpop.permute.xlu0 %130  ;;  %v239_v3 = vadd.f32 %v220_v61, %v207_v62 }
  0x96   :  { %v203_v10 = vmul.f32 %v1240_v47, %v131_v9  ;;  %369 = vmatmul.bf16.vlgmr.msra.gmra.mxu2 %v269_v7  ;;  %v236_v19 = vadd.f32 %v218_v14, %v204_v15  ;;  %v1009_v15 = vld [vmem:[%s1546_s6] ss:$0 sm:$0xff] }
  0x97   :  { %v255_v7 = vmax.f32 %v239_v3, 0.0 }
  0x98   :  { %v235_v16 = vadd.f32 %v218_v14, %v203_v10  ;;  %v252_v25 = vmax.f32 %v236_v19, 0.0 }
  0x9a   :  { %v251_v21 = vmax.f32 %v235_v16, 0.0 }
  0x9b   :  { %v141_v27 = vpop.permute.xlu1 %140 }
  0x9c   :  { %v266_v26 = vpack.c.bf16 %v252_v25, %v251_v21  ;;  %v205_v31 = vmul.f32 %v1240_v47, %v141_v27 }
  0x9d   :  { %v186_v22 = vpop.permute.xlu0 %185 }
  0x9e   :  { %v214_v36 = vmul.f32 %v1240_v47, %v186_v22  ;;  %v237_v41 = vadd.f32 %v219_v34, %v205_v31 }
  0xa0   :  { %v246_v43 = vadd.f32 %v223_v39, %v214_v36  ;;  %v253_v48 = vmax.f32 %v237_v41, 0.0 }
  0xa2   :  { %v262_v50 = vmax.f32 %v246_v43, 0.0  ;;  %v267_v53 = vpack.c.bf16 %v254_v49, %v253_v48 }
  0xa3   :  { %v196_v60 = vpop.permute.xlu1 %195 }
  0xa4   :  { %354 = vmatmul.bf16.gmra.mxu0 %v266_v26  ;;  %v271_v56 = vpack.c.bf16 %v262_v50, %v261_v52  ;;  %v216_v1 = vmul.f32 %v1240_v47, %v196_v60 }
  0xa5   :  { %v191_v38 = vpop.permute.xlu0 %190 }
  0xa6   :  { %374 = vmatmul.bf16.gmra.mxu2 %v270_v29  ;;  %v215_v63 = vmul.f32 %v1240_v47, %v191_v38  ;;  %v248_v5 = vadd.f32 %v224_v0, %v216_v1 }
  0xa8   :  { %v247_v4 = vadd.f32 %v224_v0, %v215_v63  ;;  %v264_v8 = vmax.f32 %v248_v5, 0.0 }
  0xaa   :  { %v263_v45 = vmax.f32 %v247_v4, 0.0 }
  0xac   :  { %v272_v10 = vpack.c.bf16 %v264_v8, %v263_v45  ;;  %v1272_v8 = vld [vmem:[%s1548_s8] ss:$0 sm:$0xff]  ;;  %s1160_s8 = smov [#allocation7]  }
  0xad   :  { %v156_v54 = vpop.permute.xlu0 %155  ;;  %s890_s10 = sshll.u32 %s1160_s8, 4  ;;  %s891_s10 = int_to_ptr.vmem [resolvable:$true] %s890_s10 }
  0xae   :  { %v208_v58 = vmul.f32 %v1240_v47, %v156_v54  ;;  %v975_v47 = vld [vmem:[#allocation5] sm:$0xff] }
  0xaf   :  { %489 = vmatpush.bf16.msra.mxu1 %v975_v47  ;;  %998 = vmatpush.bf16.msra.mxu3 %v975_v47 }
  0xb0   :  { %v240_v2 = vadd.f32 %v220_v61, %v208_v58 }
  0xb2   :  { %v256_v6 = vmax.f32 %v240_v2, 0.0 }
  0xb4   :  { %359 = vmatmul.bf16.gmra.mxu0 %v267_v53  ;;  %v268_v9 = vpack.c.bf16 %v256_v6, %v255_v7 }
  0xb6   :  { %379 = vmatmul.bf16.gmra.mxu2 %v271_v56 }
  0xc4   :  { %364 = vmatmul.bf16.gmra.mxu0 %v268_v9 }
  0xc6   :  { %384 = vmatmul.bf16.gmra.mxu2 %v272_v10 }
 0x111   :  { %v350_v14 = vpop.f32.mrf.mxu0 }
 0x112   :  { %v351_v16 = vadd.f32 %v1009_v15, %v350_v14 }
 0x114   :  { %v390_v20 = vmax.f32 %v351_v16, 0.0 }
 0x119   :  { %v352_v17 = vpop.f32.mrf.mxu0  ;;  %v370_v18 = vpop.f32.mrf.mxu2 }
 0x11a   :  { %v353_v19 = vadd.f32 %v1009_v15, %v352_v17  ;;  %v371_v23 = vadd.f32 %v1009_v15, %v370_v18 }
 0x11c   :  { %v391_v21 = vmax.f32 %v353_v19, 0.0  ;;  %v398_v27 = vmax.f32 %v371_v23, 0.0 }
 0x11e   :  { %v406_v22 = vpack.c.bf16 %v391_v21, %v390_v20 }
 0x120   :  { %490 = vmatmul.bf16.vlgmr.msra.gmra.mxu1 %v406_v22 }
 0x121   :  { %v355_v24 = vpop.f32.mrf.mxu0  ;;  %v372_v25 = vpop.f32.mrf.mxu2 }
 0x122   :  { %v373_v26 = vadd.f32 %v1009_v15, %v372_v25  ;;  %v356_v30 = vadd.f32 %v1009_v15, %v355_v24 }
 0x124   :  { %v399_v28 = vmax.f32 %v373_v26, 0.0  ;;  %v392_v34 = vmax.f32 %v356_v30, 0.0 }
 0x126   :  { %v410_v29 = vpack.c.bf16 %v399_v28, %v398_v27 }
 0x128   :  { %510 = vmatmul.bf16.vlgmr.msra.gmra.mxu3 %v410_v29 }
 0x129   :  { %v357_v31 = vpop.f32.mrf.mxu0  ;;  %v375_v32 = vpop.f32.mrf.mxu2 }
 0x12a   :  { %v358_v33 = vadd.f32 %v1009_v15, %v357_v31  ;;  %v376_v37 = vadd.f32 %v1009_v15, %v375_v32 }
 0x12c   :  { %v393_v35 = vmax.f32 %v358_v33, 0.0  ;;  %v400_v41 = vmax.f32 %v376_v37, 0.0 }
 0x12e   :  { %v407_v36 = vpack.c.bf16 %v393_v35, %v392_v34 }
 0x130   :  { %495 = vmatmul.bf16.gmra.mxu1 %v407_v36 }
 0x131   :  { %v360_v38 = vpop.f32.mrf.mxu0  ;;  %v377_v39 = vpop.f32.mrf.mxu2 }
 0x132   :  { %v378_v40 = vadd.f32 %v1009_v15, %v377_v39  ;;  %v361_v44 = vadd.f32 %v1009_v15, %v360_v38 }
 0x134   :  { %v401_v42 = vmax.f32 %v378_v40, 0.0  ;;  %v394_v50 = vmax.f32 %v361_v44, 0.0 }
 0x136   :  { %v411_v43 = vpack.c.bf16 %v401_v42, %v400_v41 }
 0x138   :  { %515 = vmatmul.bf16.gmra.mxu3 %v411_v43 }
 0x139   :  { %v362_v46 = vpop.f32.mrf.mxu0  ;;  %v380_v48 = vpop.f32.mrf.mxu2 }
 0x13a   :  { %v363_v49 = vadd.f32 %v1009_v15, %v362_v46  ;;  %v381_v53 = vadd.f32 %v1009_v15, %v380_v48 }
 0x13c   :  { %v395_v51 = vmax.f32 %v363_v49, 0.0  ;;  %v402_v57 = vmax.f32 %v381_v53, 0.0 }
 0x13e   :  { %v408_v52 = vpack.c.bf16 %v395_v51, %v394_v50 }
 0x140   :  { %500 = vmatmul.bf16.gmra.mxu1 %v408_v52 }
 0x141   :  { %v365_v54 = vpop.f32.mrf.mxu0  ;;  %v382_v55 = vpop.f32.mrf.mxu2 }
 0x142   :  { %v383_v56 = vadd.f32 %v1009_v15, %v382_v55  ;;  %v366_v60 = vadd.f32 %v1009_v15, %v365_v54 }
 0x144   :  { %v403_v58 = vmax.f32 %v383_v56, 0.0  ;;  %v396_v0 = vmax.f32 %v366_v60, 0.0 }
 0x146   :  { %v412_v59 = vpack.c.bf16 %v403_v58, %v402_v57 }
 0x148   :  { %520 = vmatmul.bf16.gmra.mxu3 %v412_v59 }
 0x149   :  { %v367_v61 = vpop.f32.mrf.mxu0  ;;  %v385_v62 = vpop.f32.mrf.mxu2 }
 0x14a   :  { %v368_v63 = vadd.f32 %v1009_v15, %v367_v61  ;;  %v386_v3 = vadd.f32 %v1009_v15, %v385_v62 }
 0x14c   :  { %v397_v1 = vmax.f32 %v368_v63, 0.0  ;;  %v404_v6 = vmax.f32 %v386_v3, 0.0 }
 0x14e   :  { %v409_v2 = vpack.c.bf16 %v397_v1, %v396_v0 }
 0x150   :  { %505 = vmatmul.bf16.gmra.mxu1 %v409_v2 }
 0x151   :  { %v387_v4 = vpop.f32.mrf.mxu2 }
 0x152   :  { %v388_v5 = vadd.f32 %v1009_v15, %v387_v4 }
 0x154   :  { %v405_v7 = vmax.f32 %v388_v5, 0.0 }
 0x156   :  { %v413_v45 = vpack.c.bf16 %v405_v7, %v404_v6 }
 0x158   :  { %525 = vmatmul.bf16.gmra.mxu3 %v413_v45 }
 0x19d   :  { %v491_v9 = vpop.f32.mrf.mxu1 }
 0x19e   :  { %v1275_v10 = vadd.f32 %v1272_v8, %v491_v9 }
 0x1a0   :  { %v531_v11 = vand.u32 2147483647, %v1275_v10 }
 0x1a2   :  { %v547_v47 = vsub.f32 0.0, %v531_v11 }
 0x1a4   :  { %v563_v16 = vmul.f32 1.442695, %v547_v47 }
 0x1a5   :  { %v493_v12 = vpop.f32.mrf.mxu1 }
 0x1a6   :  { %v1279_v13 = vadd.f32 %v1272_v8, %v493_v12  ;;  %1011 = vpow2.f32 %v563_v16 }
 0x1a8   :  { %v532_v14 = vand.u32 2147483647, %v1279_v13 }
 0x1aa   :  { %v548_v15 = vsub.f32 0.0, %v532_v14  ;;  %v739_v14 = vmax.f32 %v1275_v10, 0.0 }
 0x1ab   :  { %v511_v17 = vpop.f32.mrf.mxu3 }
 0x1ac   :  { %v1283_v18 = vadd.f32 %v1272_v8, %v511_v17  ;;  %v565_v19 = vmul.f32 1.442695, %v548_v15  ;;  %v1012_v27 = vpop.eup %1011 }
 0x1ad   :  { %v496_v20 = vpop.f32.mrf.mxu1  ;;  %v595_v34 = vadd.f32 1.0, %v1012_v27  ;;  %v598_v43 = vmul.f32 -0.5, %v1012_v27  ;;  %v601_v58 = vand.u32 2147483647, %v1012_v27 }
 0x1ae   :  { %v1286_v21 = vadd.f32 %v1272_v8, %v496_v20  ;;  %v539_v22 = vand.u32 2147483647, %v1283_v18  ;;  %1013 = vpow2.f32 %v565_v19  ;;  %v740_v20 = vmax.f32 %v1279_v13, 0.0 }
 0x1af   :  { %v599_v55 = vadd.f32 1.0, %v598_v43  ;;  %vm1314_vm0 = vcmp.lt.f32.partialorder %v601_v58, 0.0004427343 }
 0x1b0   :  { %v533_v23 = vand.u32 2147483647, %v1286_v21  ;;  %v555_v24 = vsub.f32 0.0, %v539_v22  ;;  %v747_v22 = vmax.f32 %v1283_v18, 0.0 }
 0x1b1   :  { %v600_v3 = vmul.f32 %v1012_v27, %v599_v55  ;;  %v741_v27 = vmax.f32 %v1286_v21, 0.0 }
 0x1b2   :  { %v549_v28 = vsub.f32 0.0, %v533_v23  ;;  %v579_v32 = vmul.f32 1.442695, %v555_v24 }
 0x1b3   :  { %v513_v25 = vpop.f32.mrf.mxu3 }
 0x1b4   :  { %v1291_v26 = vadd.f32 %v1272_v8, %v513_v25  ;;  %v1014_v31 = vpop.eup %1013  ;;  %v567_v35 = vmul.f32 1.442695, %v549_v28  ;;  %1015 = vpow2.f32 %v579_v32 }
 0x1b5   :  { %v498_v29 = vpop.f32.mrf.mxu1  ;;  %v604_v38 = vadd.f32 1.0, %v1014_v31  ;;  %1017 = vlog2.f32 %v595_v34  ;;  %v607_v48 = vmul.f32 -0.5, %v1014_v31  ;;  %v610_v63 = vand.u32 2147483647, %v1014_v31 }
 0x1b6   :  { %v540_v30 = vand.u32 2147483647, %v1291_v26  ;;  %v1295_v33 = vadd.f32 %v1272_v8, %v498_v29  ;;  %1019 = vpow2.f32 %v567_v35  ;;  %v748_v18 = vmax.f32 %v1291_v26, 0.0 }
 0x1b7   :  { %1021 = vlog2.f32 %v604_v38  ;;  %v608_v59 = vadd.f32 1.0, %v607_v48  ;;  %vm1323_vm1 = vcmp.lt.f32.partialorder %v610_v63, 0.0004427343  ;;  %v1349_v38 = vpop.permute.xlu1 %775 }
 0x1b8   :  { %v556_v36 = vsub.f32 0.0, %v540_v30  ;;  %v534_v37 = vand.u32 2147483647, %v1295_v33 }
 0x1b9   :  { %v609_v6 = vmul.f32 %v1014_v31, %v608_v59 }
 0x1ba   :  { %v581_v40 = vmul.f32 1.442695, %v556_v36  ;;  %v550_v41 = vsub.f32 0.0, %v534_v37  ;;  %v1301_v46 = vpop.eup %1015 }
 0x1bb   :  { %v516_v39 = vpop.f32.mrf.mxu3  ;;  %v1018_v51 = vpop.eup %1017  ;;  %v667_v56 = vadd.f32 1.0, %v1301_v46  ;;  %v670_v16 = vmul.f32 -0.5, %v1301_v46  ;;  %v673_v13 = vand.u32 2147483647, %v1301_v46 }
 0x1bc   :  { %v1299_v44 = vadd.f32 %v1272_v8, %v516_v39  ;;  %1023 = vpow2.f32 %v581_v40  ;;  %v569_v49 = vmul.f32 1.442695, %v550_v41  ;;  %v1306_v52 = vpop.eup %1019  ;;  %v597_v62 = vmul.f32 0.6931472, %v1018_v51 }
 0x1bd   :  { %v501_v42 = vpop.f32.mrf.mxu1  ;;  %v1022_v54 = vpop.eup %1021  ;;  %v613_v0 = vadd.f32 1.0, %v1306_v52  ;;  %v616_v23 = vmul.f32 -0.5, %v1306_v52  ;;  %v671_v34 = vadd.f32 1.0, %v670_v16  ;;  %v742_v41 = vmax.f32 %v1295_v33, 0.0 }
 0x1be   :  { %v1304_v50 = vadd.f32 %v1272_v8, %v501_v42  ;;  %v541_v57 = vand.u32 2147483647, %v1299_v44  ;;  %1025 = vpow2.f32 %v569_v49  ;;  %v606_v2 = vmul.f32 0.6931472, %v1022_v54  ;;  %v1353_v42 = vpop.permute.xlu2 %780 }
 0x1bf   :  { %1027 = vlog2.f32 %v667_v56  ;;  %v603_v9 = vsel %vm1314_vm0, %v600_v3, %v597_v62  ;;  %v617_v39 = vadd.f32 1.0, %v616_v23  ;;  %v672_v55 = vmul.f32 %v1301_v46, %v671_v34 }
 0x1c0   :  { %v535_v60 = vand.u32 2147483647, %v1304_v50  ;;  %v557_v4 = vsub.f32 0.0, %v541_v57  ;;  %1029 = vlog2.f32 %v613_v0  ;;  %v612_v15 = vsel %vm1323_vm1, %v609_v6, %v606_v2 }
 0x1c1   :  { %v755_v25 = vadd.f32 %v739_v14, %v603_v9  ;;  %v756_v30 = vadd.f32 %v740_v20, %v612_v15  ;;  %vm1359_vm2 = vcmp.lt.f32.partialorder %v673_v13, 0.0004427343  ;;  %v749_v62 = vmax.f32 %v1299_v44, 0.0 }
 0x1c2   :  { %v1312_v1 = vpop.eup %1023  ;;  %v551_v7 = vsub.f32 0.0, %v535_v60  ;;  %v583_v24 = vmul.f32 1.442695, %v557_v4  ;;  %v618_v60 = vmul.f32 %v1306_v52, %v617_v39  ;;  %v743_v14 = vmax.f32 %v1304_v50, 0.0 }
 0x1c3   :  { %v518_v53 = vpop.f32.mrf.mxu3  ;;  %v676_v12 = vadd.f32 1.0, %v1312_v1  ;;  %v679_v40 = vmul.f32 -0.5, %v1312_v1  ;;  %v783_v43 = vmul.f32 %v1349_v38, %v755_v25  ;;  %v784_v51 = vmul.f32 %v1353_v42, %v756_v30 }
 0x1c4   :  { %v1319_v45 = vadd.f32 %v1272_v8, %v518_v53  ;;  %v1328_v47 = vpop.eup %1025  ;;  %v571_v10 = vmul.f32 1.442695, %v551_v7  ;;  %v619_v53 = vand.u32 2147483647, %v1306_v52  ;;  %v682_v52 = vand.u32 2147483647, %v1312_v1 }
 0x1c5   :  { %v503_v61 = vpop.f32.mrf.mxu1  ;;  %v1028_v29 = vpop.eup %1027  ;;  %1031 = vlog2.f32 %v676_v12  ;;  %v622_v31 = vadd.f32 1.0, %v1328_v47  ;;  %v625_v46 = vmul.f32 -0.5, %v1328_v47  ;;  %v1371_v6 = vadd.f32 %v784_v51, %v783_v43 }
 0x1c6   :  { %v1335_v17 = vadd.f32 %v1272_v8, %v503_v61  ;;  %v542_v28 = vand.u32 2147483647, %v1319_v45  ;;  %v1030_v37 = vpop.eup %1029  ;;  %1033 = vpow2.f32 %v583_v24  ;;  %v669_v48 = vmul.f32 0.6931472, %v1028_v29 }
 0x1c7   :  { %1035 = vpow2.f32 %v571_v10  ;;  %v615_v57 = vmul.f32 0.6931472, %v1030_v37  ;;  %v680_v61 = vadd.f32 1.0, %v679_v40  ;;  %vm1373_vm3 = vcmp.lt.f32.partialorder %v619_v53, 0.0004427343 }
 0x1c8   :  { %v536_v32 = vand.u32 2147483647, %v1335_v17  ;;  %v558_v49 = vsub.f32 0.0, %v542_v28  ;;  %1037 = vlog2.f32 %v622_v31  ;;  %v675_v2 = vsel %vm1359_vm2, %v672_v55, %v669_v48 }
 0x1c9   :  { %v621_v11 = vsel %vm1373_vm3, %v618_v60, %v615_v57  ;;  %v681_v20 = vmul.f32 %v1312_v1, %v680_v61  ;;  %v626_v25 = vadd.f32 1.0, %v625_v46  ;;  %v628_v10 = vand.u32 2147483647, %v1328_v47 }
 0x1ca   :  { %v552_v54 = vsub.f32 0.0, %v536_v32  ;;  %v585_v3 = vmul.f32 1.442695, %v558_v49  ;;  %v800_v30 = vrot.slane %v1371_v6, 4  ;;  %v757_v31 = vadd.f32 %v741_v27, %v621_v11 }
 0x1cb   :  { %v521_v19 = vpop.f32.mrf.mxu3  ;;  %v1032_v59 = vpop.eup %1031  ;;  %vm1395_vm4 = vcmp.lt.f32.partialorder %v682_v52, 0.0004427343  ;;  %v627_v40 = vmul.f32 %v1328_v47, %v626_v25  ;;  %vm1412_vm5 = vcmp.lt.f32.partialorder %v628_v10, 0.0004427343  ;;  %v750_v26 = vmax.f32 %v1319_v45, 0.0 }
 0x1cc   :  { %v1347_v35 = vadd.f32 %v1272_v8, %v521_v19  ;;  %v573_v63 = vmul.f32 1.442695, %v552_v54  ;;  %v1369_v5 = vpop.eup %1033  ;;  %v678_v12 = vmul.f32 0.6931472, %v1032_v59  ;;  %v763_v19 = vadd.f32 %v747_v22, %v675_v2 }
 0x1cd   :  { %v506_v36 = vpop.f32.mrf.mxu1  ;;  %v1378_v9 = vpop.eup %1035  ;;  %v685_v28 = vadd.f32 1.0, %v1369_v5  ;;  %v688_v13 = vmul.f32 -0.5, %v1369_v5  ;;  %v785_v49 = vmul.f32 %v1349_v38, %v757_v31  ;;  %v691_v53 = vand.u32 2147483647, %v1369_v5 }
 0x1ce   :  { %v543_v58 = vand.u32 2147483647, %v1347_v35  ;;  %1039 = vpow2.f32 %v573_v63  ;;  %v1384_v15 = vadd.f32 %v1272_v8, %v506_v36  ;;  %v1038_v16 = vpop.eup %1037  ;;  %v631_v1 = vadd.f32 1.0, %v1378_v9 }
 0x1cf   :  { %1041 = vpow2.f32 %v585_v3  ;;  %v684_v32 = vsel %vm1395_vm4, %v681_v20, %v678_v12  ;;  %v624_v34 = vmul.f32 0.6931472, %v1038_v16  ;;  %v1405_v39 = vmul.f32 %v1349_v38, %v763_v19 }
 0x1d0   :  { %v559_v4 = vsub.f32 0.0, %v543_v58  ;;  %v537_v36 = vand.u32 2147483647, %v1384_v15  ;;  %v764_v51 = vadd.f32 %v748_v18, %v684_v32  ;;  %v689_v56 = vadd.f32 1.0, %v688_v13 }
 0x1d1   :  { %v630_v47 = vsel %vm1412_vm5, %v627_v40, %v624_v34  ;;  %v634_v58 = vmul.f32 -0.5, %v1378_v9  ;;  %v744_v18 = vmax.f32 %v1335_v17, 0.0  ;;  %vm1435_vm6 = vcmp.lt.f32.partialorder %v691_v53, 0.0004427343 }
 0x1d2   :  { %v587_v23 = vmul.f32 1.442695, %v559_v4  ;;  %v553_v57 = vsub.f32 0.0, %v537_v36  ;;  %v758_v46 = vadd.f32 %v742_v41, %v630_v47  ;;  %v637_v4 = vand.u32 2147483647, %v1378_v9 }
 0x1d3   :  { %v523_v0 = vpop.f32.mrf.mxu3  ;;  %v1442_v17 = vmul.f32 %v1353_v42, %v764_v51  ;;  %v690_v19 = vmul.f32 %v1369_v5, %v689_v56  ;;  %v635_v33 = vadd.f32 1.0, %v634_v58  ;;  %v751_v36 = vmax.f32 %v1347_v35, 0.0 }
 0x1d4   :  { %v1388_v24 = vadd.f32 %v1272_v8, %v523_v0  ;;  %v1040_v37 = vpop.eup %1039  ;;  %1043 = vpow2.f32 %v587_v23  ;;  %v575_v63 = vmul.f32 1.442695, %v553_v57  ;;  %vm1448_vm7 = vcmp.lt.f32.partialorder %v637_v4, 0.0004427343 }
 0x1d5   :  { %v508_v29 = vpop.f32.mrf.mxu1  ;;  %1045 = vlog2.f32 %v685_v28  ;;  %v640_v48 = vadd.f32 1.0, %v1040_v37  ;;  %v1420_v55 = vpop.eup %1041  ;;  %v643_v59 = vmul.f32 -0.5, %v1040_v37  ;;  %v646_v20 = vand.u32 2147483647, %v1040_v37 }
 0x1d6   :  { %v544_v21 = vand.u32 2147483647, %v1388_v24  ;;  %v1409_v27 = vadd.f32 %v1272_v8, %v508_v29  ;;  %1047 = vlog2.f32 %v631_v1  ;;  %v694_v7 = vadd.f32 1.0, %v1420_v55 }
 0x1d7   :  { %1049 = vlog2.f32 %v640_v48  ;;  %v644_v41 = vadd.f32 1.0, %v643_v59  ;;  %v786_v29 = vmul.f32 %v1353_v42, %v758_v46  ;;  %v636_v34 = vmul.f32 %v1378_v9, %v635_v33 }
 0x1d8   :  { %v560_v60 = vsub.f32 0.0, %v544_v21  ;;  %v538_v61 = vand.u32 2147483647, %v1409_v27  ;;  %1051 = vpow2.f32 %v575_v63  ;;  %v745_v21 = vmax.f32 %v1384_v15, 0.0 }
 0x1d9   :  { %v645_v13 = vmul.f32 %v1040_v37, %v644_v41  ;;  %v697_v48 = vmul.f32 -0.5, %v1420_v55  ;;  %vm1456_vm8 = vcmp.lt.f32.partialorder %v646_v20, 0.0004427343  ;;  %v752_v58 = vmax.f32 %v1388_v24, 0.0 }
 0x1da   :  { %v1431_v2 = vpop.eup %1043  ;;  %v589_v11 = vmul.f32 1.442695, %v560_v60  ;;  %v554_v12 = vsub.f32 0.0, %v538_v61  ;;  %v801_v15 = vadd.f32 %v800_v30, %v1371_v6  ;;  %vm867_vm0 = vcmask 1041409  }
 0x1db   :  { %v526_v54 = vpop.f32.mrf.mxu3  ;;  %v1046_v52 = vpop.eup %1045  ;;  %v703_v25 = vadd.f32 1.0, %v1431_v2  ;;  %v706_v61 = vmul.f32 -0.5, %v1431_v2  ;;  %v698_v4 = vadd.f32 1.0, %v697_v48  ;;  %vm869_vm1 = vcmask 1042434  }
 0x1dc   :  { %v1429_v0 = vadd.f32 %v1272_v8, %v526_v54  ;;  %v1048_v16 = vpop.eup %1047  ;;  %1053 = vpow2.f32 %v589_v11  ;;  %v577_v10 = vmul.f32 1.442695, %v554_v12  ;;  %v687_v31 = vmul.f32 0.6931472, %v1046_v52 }
 0x1dd   :  { %v1050_v23 = vpop.eup %1049  ;;  %1055 = vlog2.f32 %v694_v7  ;;  %v633_v1 = vmul.f32 0.6931472, %v1048_v16  ;;  %v1460_v54 = vadd.f32 %v786_v29, %v785_v49  ;;  %v700_v49 = vand.u32 2147483647, %v1420_v55 }
 0x1de   :  { %v545_v28 = vand.u32 2147483647, %v1429_v0  ;;  %v642_v22 = vmul.f32 0.6931472, %v1050_v23  ;;  %1057 = vpow2.f32 %v577_v10  ;;  %v1052_v43 = vpop.eup %1051  ;;  %v693_v9 = vsel %vm1435_vm6, %v690_v19, %v687_v31 }
 0x1df   :  { %1059 = vlog2.f32 %v703_v25  ;;  %v649_v47 = vadd.f32 1.0, %v1052_v43  ;;  %v639_v57 = vsel %vm1448_vm7, %v636_v34, %v633_v1  ;;  %v652_v63 = vmul.f32 -0.5, %v1052_v43 }
 0x1e0   :  { %v561_v5 = vsub.f32 0.0, %v545_v28  ;;  %v648_v37 = vsel %vm1456_vm8, %v645_v13, %v642_v22  ;;  %v1476_v3 = vadd.f32 %v749_v62, %v693_v9  ;;  %v807_v11 = vrot.slane %v1460_v54, 4 }
 0x1e1   :  { %v760_v7 = vadd.f32 %v744_v18, %v648_v37  ;;  %v709_v12 = vand.u32 2147483647, %v1431_v2  ;;  %vm1483_vm9 = vcmp.lt.f32.partialorder %v700_v49, 0.0004427343  ;;  %v707_v62 = vadd.f32 1.0, %v706_v61 }
 0x1e2   :  { %v591_v53 = vmul.f32 1.442695, %v561_v5  ;;  %v1054_v56 = vpop.eup %1053  ;;  %v653_v18 = vadd.f32 1.0, %v652_v63  ;;  %v699_v50 = vmul.f32 %v1420_v55, %v698_v4  ;;  %v655_v10 = vand.u32 2147483647, %v1052_v43 }
 0x1e3   :  { %v528_v40 = vpop.f32.mrf.mxu3  ;;  %v1056_v60 = vpop.eup %1055  ;;  %v712_v52 = vadd.f32 1.0, %v1054_v56  ;;  %v715_v16 = vmul.f32 -0.5, %v1054_v56  ;;  %vm1492_vm10 = vcmp.lt.f32.partialorder %v709_v12, 0.0004427343  ;;  %v718_v34 = vand.u32 2147483647, %v1054_v56 }
 0x1e4   :  { %1061 = vpow2.f32 %v591_v53  ;;  %v1470_v59 = vadd.f32 %v1272_v8, %v528_v40  ;;  %v1058_v46 = vpop.eup %1057  ;;  %v759_v8 = vadd.f32 %v743_v14, %v639_v57  ;;  %v696_v33 = vmul.f32 0.6931472, %v1056_v60 }
 0x1e5   :  { %1063 = vlog2.f32 %v649_v47  ;;  %v1060_v19 = vpop.eup %1059  ;;  %v658_v41 = vadd.f32 1.0, %v1058_v46  ;;  %v661_v23 = vmul.f32 -0.5, %v1058_v46  ;;  %v788_v14 = vmul.f32 %v1353_v42, %v760_v7 }
 0x1e6   :  { %1065 = vlog2.f32 %v712_v52  ;;  %v546_v20 = vand.u32 2147483647, %v1470_v59  ;;  %v787_v29 = vmul.f32 %v1349_v38, %v759_v8  ;;  %v705_v31 = vmul.f32 0.6931472, %v1060_v19 }
 0x1e7   :  { %1067 = vlog2.f32 %v658_v41  ;;  %v716_v1 = vadd.f32 1.0, %v715_v16  ;;  %v702_v32 = vsel %vm1483_vm9, %v699_v50, %v696_v33  ;;  %v708_v55 = vmul.f32 %v1431_v2, %v707_v62 }
 0x1e8   :  { %v562_v13 = vsub.f32 0.0, %v546_v20  ;;  %v654_v40 = vmul.f32 %v1052_v43, %v653_v18  ;;  %v662_v48 = vadd.f32 1.0, %v661_v23  ;;  %v813_v9 = vadd.f32 %v788_v14, %v787_v29 }
 0x1e9   :  { %vm1500_vm11 = vcmp.lt.f32.partialorder %v655_v10, 0.0004427343  ;;  %v664_v47 = vand.u32 2147483647, %v1058_v46  ;;  %v766_v60 = vadd.f32 %v750_v26, %v702_v32  ;;  %v717_v2 = vmul.f32 %v1054_v56, %v716_v1 }
 0x1ea   :  { %v1487_v25 = vpop.eup %1061  ;;  %v593_v57 = vmul.f32 1.442695, %v562_v13  ;;  %v711_v63 = vsel %vm1492_vm10, %v708_v55, %v705_v31  ;;  %vm719_vm12 = vcmp.lt.f32.partialorder %v718_v34, 0.0004427343  ;;  %v746_v4 = vmax.f32 %v1409_v27, 0.0 }
 0x1eb   :  { %v1064_v28 = vpop.eup %1063  ;;  %v721_v51 = vadd.f32 1.0, %v1487_v25  ;;  %v663_v8 = vmul.f32 %v1058_v46, %v662_v48  ;;  %v814_v12 = vrot.slane %v813_v9, 4  ;;  %vm665_vm13 = vcmp.lt.f32.partialorder %v664_v47, 0.0004427343 }
 0x1ec   :  { %v651_v5 = vmul.f32 0.6931472, %v1064_v28  ;;  %v1066_v53 = vpop.eup %1065  ;;  %1069 = vpow2.f32 %v593_v57  ;;  %v827_v56 = vadd.f32 %v1442_v17, %v1405_v39  ;;  %v794_v16 = vmul.f32 %v1353_v42, %v766_v60 }
 0x1ed   :  { %v714_v61 = vmul.f32 0.6931472, %v1066_v53  ;;  %v1068_v43 = vpop.eup %1067  ;;  %1071 = vlog2.f32 %v721_v51  ;;  %v767_v27 = vadd.f32 %v751_v36, %v711_v63  ;;  %v724_v46 = vmul.f32 -0.5, %v1487_v25 }
 0x1ee   :  { %v657_v49 = vsel %vm1500_vm11, %v654_v40, %v651_v5  ;;  %v660_v52 = vmul.f32 0.6931472, %v1068_v43  ;;  %v808_v24 = vadd.f32 %v807_v11, %v1460_v54  ;;  %v815_v39 = vadd.f32 %v814_v12, %v813_v9 }
 0x1ef   :  { %v720_v7 = vsel %vm719_vm12, %v717_v2, %v714_v61  ;;  %v761_v45 = vadd.f32 %v745_v21, %v657_v49  ;;  %v793_v21 = vmul.f32 %v1349_v38, %v1476_v3  ;;  %v828_v20 = vrot.slane %v827_v56, 4 }
 0x1f0   :  { %v768_v26 = vadd.f32 %v752_v58, %v720_v7  ;;  %v666_v19 = vsel %vm665_vm13, %v663_v8, %v660_v52  ;;  %v795_v18 = vmul.f32 %v1349_v38, %v767_v27  ;;  %v725_v30 = vadd.f32 1.0, %v724_v46 }
 0x1f1   :  { %v762_v33 = vadd.f32 %v746_v4, %v666_v19  ;;  %v789_v17 = vmul.f32 %v1349_v38, %v761_v45  ;;  %v834_v44 = vadd.f32 %v794_v16, %v793_v21  ;;  %v802_v11 = vrot.slane %v801_v15, 2 }
 0x1f2   :  { %v1070_v58 = vpop.eup %1069  ;;  %v796_v41 = vmul.f32 %v1353_v42, %v768_v26  ;;  %v809_v23 = vrot.slane %v808_v24, 2  ;;  %v727_v3 = vand.u32 2147483647, %v1487_v25  ;;  %v816_v50 = vrot.slane %v815_v39, 2 }
 0x1f3   :  { %v790_v35 = vmul.f32 %v1353_v42, %v762_v33  ;;  %v1072_v36 = vpop.eup %1071  ;;  %v730_v62 = vadd.f32 1.0, %v1070_v58  ;;  %v733_v54 = vmul.f32 -0.5, %v1070_v58  ;;  %v835_v29 = vrot.slane %v834_v44, 4 }
 0x1f4   :  { %v841_v14 = vadd.f32 %v796_v41, %v795_v18  ;;  %v723_v28 = vmul.f32 0.6931472, %v1072_v36  ;;  %v829_v31 = vadd.f32 %v828_v20, %v827_v56  ;;  %v726_v1 = vmul.f32 %v1487_v25, %v725_v30 }
 0x1f5   :  { %v820_v6 = vadd.f32 %v790_v35, %v789_v17  ;;  %1073 = vlog2.f32 %v730_v62  ;;  %v734_v32 = vadd.f32 1.0, %v733_v54  ;;  %v803_v5 = vadd.f32 %v802_v11, %v801_v15 }
 0x1f6   :  { %v810_v34 = vadd.f32 %v809_v23, %v808_v24  ;;  %vm728_vm14 = vcmp.lt.f32.partialorder %v727_v3, 0.0004427343  ;;  %v736_v13 = vand.u32 2147483647, %v1070_v58  ;;  %v817_v55 = vadd.f32 %v816_v50, %v815_v39  ;;  %v857_v23 = vpop.permute.xlu0 %856 }
 0x1f7   :  { %v821_v10 = vrot.slane %v820_v6, 4  ;;  %v842_v40 = vrot.slane %v841_v14, 4  ;;  %v729_v51 = vsel %vm728_vm14, %v726_v1, %v723_v28  ;;  %v836_v9 = vadd.f32 %v835_v29, %v834_v44 }
 0x1f8   :  { %v753_v37 = vmax.f32 %v1429_v0, 0.0  ;;  %v830_v47 = vrot.slane %v829_v31, 2  ;;  %v735_v49 = vmul.f32 %v1070_v58, %v734_v32  ;;  %v811_v61 = vrot.slane %v810_v34, 1 }
 0x1f9   :  { %v822_v22 = vadd.f32 %v821_v10, %v820_v6  ;;  %vm737_vm15 = vcmp.lt.f32.partialorder %v736_v13, 0.0004427343  ;;  %v754_v25 = vmax.f32 %v1470_v59, 0.0  ;;  %v804_v43 = vrot.slane %v803_v5, 1 }
 0x1fa   :  { %v769_v2 = vadd.f32 %v753_v37, %v729_v51  ;;  %v818_v63 = vrot.slane %v817_v55, 1  ;;  %v843_v4 = vadd.f32 %v842_v40, %v841_v14  ;;  %v837_v52 = vrot.slane %v836_v9, 2 }
 0x1fb   :  { %v823_v48 = vrot.slane %v822_v22, 2  ;;  %v1074_v53 = vpop.eup %1073  ;;  %v831_v45 = vadd.f32 %v830_v47, %v829_v31  ;;  %v812_v26 = vadd.f32 %v811_v61, %v810_v34  ;;  %v805_v16 = vadd.f32 %v804_v43, %v803_v5 }
 0x1fc   :  { %v732_v60 = vmul.f32 0.6931472, %v1074_v53  ;;  %v797_v0 = vmul.f32 %v1349_v38, %v769_v2  ;;  %v819_v19 = vadd.f32 %v818_v63, %v817_v55  ;;  %v844_v27 = vrot.slane %v843_v4, 2 }
 0x1fd   :  { %v824_v57 = vadd.f32 %v823_v48, %v822_v22  ;;  %v838_v33 = vadd.f32 %v837_v52, %v836_v9  ;;  %v832_v15 = vrot.slane %v831_v45, 1  ;;  %vm871_vm2 = vcmask 1043459  }
 0x1fe   :  { %v738_v7 = vsel %vm737_vm15, %v735_v49, %v732_v60  ;;  %v868_v24 = vsel %vm867_vm0, %v812_v26, %v805_v16  ;;  %v845_v39 = vadd.f32 %v844_v27, %v843_v4  ;;  %vm873_vm3 = vcmask 1044484  }
 0x1ff   :  { %v825_v8 = vrot.slane %v824_v57, 1  ;;  %v770_v12 = vadd.f32 %v754_v25, %v738_v7  ;;  %v870_v58 = vsel %vm869_vm1, %v819_v19, %v868_v24  ;;  %v839_v17 = vrot.slane %v838_v33, 1 }
 0x200   :  { %v833_v38 = vadd.f32 %v832_v15, %v831_v45  ;;  %v846_v36 = vrot.slane %v845_v39, 1  ;;  %vm875_vm4 = vcmask 1045509   ;;  %vm877_vm5 = vcmask 1046534  }
 0x201   :  { %v798_v56 = vmul.f32 %v1353_v42, %v770_v12  ;;  %v826_v59 = vadd.f32 %v825_v8, %v824_v57  ;;  %v840_v44 = vadd.f32 %v839_v17, %v838_v33  ;;  %vm879_vm6 = vcmask 1047559  }
 0x202   :  { %v847_v30 = vadd.f32 %v846_v36, %v845_v39 }
 0x203   :  { %v848_v46 = vadd.f32 %v798_v56, %v797_v0  ;;  %v872_v41 = vsel %vm871_vm2, %v826_v59, %v870_v58 }
 0x204   :  { %v874_v20 = vsel %vm873_vm3, %v833_v38, %v872_v41 }
 0x205   :  { %v849_v21 = vrot.slane %v848_v46, 4  ;;  %v876_v6 = vsel %vm875_vm4, %v840_v44, %v874_v20 }
 0x206   :  { %v878_v11 = vsel %vm877_vm5, %v847_v30, %v876_v6 }
 0x207   :  { %v850_v35 = vadd.f32 %v849_v21, %v848_v46 }
 0x209   :  { %v851_v42 = vrot.slane %v850_v35, 2 }
 0x20b   :  { %v852_v62 = vadd.f32 %v851_v42, %v850_v35 }
 0x20d   :  { %v853_v18 = vrot.slane %v852_v62, 1 }
 0x20f   :  { %v854_v54 = vadd.f32 %v853_v18, %v852_v62 }
 0x211   :  { %v880_v3 = vsel %vm879_vm6, %v854_v54, %v878_v11 }
 0x212   :  { %v882_v50 = vmul.f32 %v880_v3, %v857_v23 }
 0x214   :  { %1075 = vtanh.f32 %v882_v50 }
 0x21a   :  { %v1076_v14 = vpop.eup %1075 }
 0x21b   :  { %884 = vst [vmem:[#allocation7] sm:$0xff] %v1076_v14 }
 0x21c   :  { %895 = dma.vmem_to_hbm [thread:$0]  %s891_s10, 128, %s893_s13, [#allocation4]  }
 0x21d   :  { %1153 = dma.done.wait [#allocation4], 128  }
 0x21e   :  { %1154 = vsyncadd [#allocation4], 4294967168 }
 0x21f   :  { %900 = vsyncpa [#allocation3], 1 }
 0x220   :  { %901 = vsyncpa [#allocation6], 1 }
 0x221   :  { %902 = vsyncpa [#allocation4], 1 }

</bundles_post_ra>
